<compile_context>
chip_gen: v6e
topology: v6e:2x2x1
jax: 0.10.0
libtpu: 0.0.40
codegen_flags: <defaults>
</compile_context>

<pallas_src>
import jax
import jax.numpy as jnp
from jax import lax
from jax.experimental import pallas as pl
from jax.experimental.pallas import tpu as pltpu


def node_decoder_kernel(x_ref, w_ref, b_ref, out_ref):
    # x_ref: [rt, k_pad]  (compute dtype)
    # w_ref: [out_pad, k_pad]  (PyTorch [out, in] layout, fused + padded)
    # b_ref: [1, out_pad]  (f32; zeros for the type portion and padding)
    acc = lax.dot_general(
        x_ref[...],
        w_ref[...],
        dimension_numbers=(((1,), (1,)), ((), ())),  # contract last dims (x @ W.T)
        preferred_element_type=jnp.float32,
    )
    out_ref[...] = (acc + b_ref[...]).astype(out_ref.dtype)


def _round_up(v, m):
    return ((v + m - 1) // m) * m


def node_decoder(x, w_type, w_hp, b_hp, *, row_tile=256, compute_dtype=None):
    """
    x      : [N, in_dim]
    w_type : [n_types, in_dim]        (PyTorch Linear weight layout)
    w_hp   : [op_hparams_dim, in_dim] (PyTorch Linear weight layout)
    b_hp   : [op_hparams_dim]
    returns (type_logits [N, n_types], hparams_emb [N, op_hparams_dim])
    """
    N, in_dim = x.shape
    n_types = w_type.shape[0]
    hp_dim = w_hp.shape[0]
    out_total = n_types + hp_dim

    cdt = x.dtype if compute_dtype is None else jnp.dtype(compute_dtype)
    out_dtype = x.dtype

    # Sub-32-bit dtypes pack 2 rows per sublane -> keep row tile a multiple of 16.
    sub = 8 if jnp.dtype(cdt).itemsize >= 4 else 16

    # Pad feature dims to lane width (128) so loads/stores are lane-dense and
    # the MXU systolic depth is filled; pad rows to the row tile.
    k_pad = _round_up(in_dim, 128)
    out_pad = _round_up(out_total, 128)
    rt = min(row_tile, _round_up(N, sub))
    rt = max(sub, _round_up(rt, sub))
    n_pad = _round_up(N, rt)

    # Fused weight [out_pad, k_pad] (type head rows first, then hparams head),
    # fused bias [1, out_pad] (zeros over the type portion and padding).
    w_cat = jnp.zeros((out_pad, k_pad), cdt)
    w_cat = w_cat.at[:n_types, :in_dim].set(w_type.astype(cdt))
    w_cat = w_cat.at[n_types:out_total, :in_dim].set(w_hp.astype(cdt))
    b_cat = jnp.zeros((1, out_pad), jnp.float32)
    b_cat = b_cat.at[0, n_types:out_total].set(b_hp.astype(jnp.float32))

    x_p = jnp.zeros((n_pad, k_pad), cdt)
    x_p = x_p.at[:N, :in_dim].set(x.astype(cdt))

    grid = (n_pad // rt,)

    itemsize = jnp.dtype(cdt).itemsize
    cost = pl.CostEstimate(
        flops=2 * n_pad * k_pad * out_pad,
        transcendentals=0,
        bytes_accessed=(
            n_pad * k_pad * itemsize          # x
            + out_pad * k_pad * itemsize      # fused weights
            + out_pad * 4                     # bias
            + n_pad * out_pad * jnp.dtype(out_dtype).itemsize  # output
        ),
    )

    out = pl.pallas_call(
        node_decoder_kernel,
        out_shape=jax.ShapeDtypeStruct((n_pad, out_pad), out_dtype),
        grid_spec=pltpu.PrefetchScalarGridSpec(
            num_scalar_prefetch=0,
            grid=grid,
            in_specs=[
                pl.BlockSpec((rt, k_pad), lambda i: (i, 0)),        # x row tile
                pl.BlockSpec((out_pad, k_pad), lambda i: (0, 0)),   # fused W (resident)
                pl.BlockSpec((1, out_pad), lambda i: (0, 0)),       # fused bias (resident)
            ],
            out_specs=pl.BlockSpec((rt, out_pad), lambda i: (i, 0)),
        ),
        compiler_params=pltpu.CompilerParams(
            dimension_semantics=("parallel",),     # shards rows across TCs on v7x
            vmem_limit_bytes=64 * 1024 * 1024,
        ),
        cost_estimate=cost,
    )(x_p, w_cat, b_cat)

    # Split the lane-dense slab back into the two heads; drop padding.
    type_logits = out[:N, :n_types]
    hparams_emb = out[:N, n_types:out_total]
    return type_logits, hparams_emb


if __name__ == "__main__":
    # Small, forward-consistent shapes.
    N = 16           # number of nodes (rows)
    in_dim = 32
    n_types = 16
    op_hparams_dim = 8

    key = jax.random.PRNGKey(0)
    kx, kwt, kwh, kbh = jax.random.split(key, 4)

    x = jax.random.normal(kx, (N, in_dim), dtype=jnp.float32)
    # Deterministic "parameters" (PyTorch Linear weight layout: [out, in]).
    w_type = jax.random.normal(kwt, (n_types, in_dim), dtype=jnp.float32) * 0.1
    w_hp = jax.random.normal(kwh, (op_hparams_dim, in_dim), dtype=jnp.float32) * 0.1
    b_hp = jax.random.normal(kbh, (op_hparams_dim,), dtype=jnp.float32) * 0.1

    type_logits, hparams_emb = node_decoder(x, w_type, w_hp, b_hp)
    jax.block_until_ready((type_logits, hparams_emb))

    # Reference check against plain JAX (same math as the PyTorch forward).
    ref_type = x @ w_type.T
    ref_hp = x @ w_hp.T + b_hp
    assert type_logits.shape == (N, n_types)
    assert hparams_emb.shape == (N, op_hparams_dim)
    assert jnp.allclose(type_logits, ref_type, atol=1e-5, rtol=1e-5)
    assert jnp.allclose(hparams_emb, ref_hp, atol=1e-5, rtol=1e-5)

    print("KERNEL_OK")
</pallas_src>

<mosaic_0001>
module attributes {stable_mosaic.version = 11 : i64} {
  func.func @node_decoder_kernel(%arg0: i32, %arg1: memref<16x128xf32, #tpu.memory_space<vmem>>, %arg2: memref<128x128xf32, #tpu.memory_space<vmem>>, %arg3: memref<1x128xf32, #tpu.memory_space<vmem>>, %arg4: memref<16x128xf32, #tpu.memory_space<vmem>>) attributes {dimension_semantics = [#tpu.dimension_semantics<parallel>], iteration_bounds = array<i64: 1>, scalar_prefetch = 0 : i64, scratch_operands = 0 : i64, tpu.core_type = #tpu.core_type<tc>, window_params = [{transform_indices = @transform_0, window_bounds = array<i64: 16, 128>}, {pipeline_mode = #tpu.pipeline_mode<synchronous>, transform_indices = @transform_1, window_bounds = array<i64: 128, 128>}, {pipeline_mode = #tpu.pipeline_mode<synchronous>, transform_indices = @transform_2, window_bounds = array<i64: 1, 128>}, {transform_indices = @transform_3, window_bounds = array<i64: 16, 128>}]} {
    %c0 = arith.constant 0 : index
    %c0_0 = arith.constant 0 : index
    %0 = vector.load %arg1[%c0, %c0_0] : memref<16x128xf32, #tpu.memory_space<vmem>>, vector<16x128xf32>
    %c0_1 = arith.constant 0 : index
    %c0_2 = arith.constant 0 : index
    %1 = vector.load %arg2[%c0_1, %c0_2] : memref<128x128xf32, #tpu.memory_space<vmem>>, vector<128x128xf32>
    %cst = arith.constant dense<0.000000e+00> : vector<16x128xf32>
    %2 = tpu.matmul %0, %1, %cst {dimension_numbers = #tpu.dot_dimension_numbers<[1], [1], [0], [0], [0, 0, 1, 0], [], []>} : vector<16x128xf32>, vector<128x128xf32>, vector<16x128xf32> -> vector<16x128xf32>
    %c0_3 = arith.constant 0 : index
    %c0_4 = arith.constant 0 : index
    %3 = vector.load %arg3[%c0_3, %c0_4] : memref<1x128xf32, #tpu.memory_space<vmem>>, vector<1x128xf32>
    %4 = vector.broadcast %3 : vector<1x128xf32> to vector<16x128xf32>
    %5 = arith.addf %2, %4 : vector<16x128xf32>
    %c0_5 = arith.constant 0 : index
    %c0_6 = arith.constant 0 : index
    %6 = vector.load %arg4[%c0_5, %c0_6] : memref<16x128xf32, #tpu.memory_space<vmem>>, vector<16x128xf32>
    tpu.vector_store %arg4[%c0_5, %c0_6], %5 {strides = array<i32>} : memref<16x128xf32, #tpu.memory_space<vmem>>, vector<16x128xf32>,
    return
  }
  func.func @transform_0(%arg0: i32) -> (i32, i32) {
    %c0_i32 = arith.constant 0 : i32
    %c0_i32_0 = arith.constant 0 : i32
    return %arg0, %c0_i32 : i32, i32
  }
  func.func @transform_1(%arg0: i32) -> (i32, i32) {
    %c0_i32 = arith.constant 0 : i32
    %c0_i32_0 = arith.constant 0 : i32
    %c0_i32_1 = arith.constant 0 : i32
    return %c0_i32, %c0_i32_0 : i32, i32
  }
  func.func @transform_2(%arg0: i32) -> (i32, i32) {
    %c0_i32 = arith.constant 0 : i32
    %c0_i32_0 = arith.constant 0 : i32
    %c0_i32_1 = arith.constant 0 : i32
    return %c0_i32, %c0_i32_0 : i32, i32
  }
  func.func @transform_3(%arg0: i32) -> (i32, i32) {
    %c0_i32 = arith.constant 0 : i32
    %c0_i32_0 = arith.constant 0 : i32
    return %arg0, %c0_i32 : i32, i32
  }
}

</mosaic_0001>

<bundles_post_ra>
// kernel: tpu_custom_call.1
= control target key start
LH: loop header
LB: loop body
LE: loop exit
PB: predicated region body
PF: predicated region fallthrough
CT: control target
= control target key end

     0   :  { %8 = vsyncpa [#allocation3], 0  ;;  %s334_s0 = inlined_call_operand.hbm [shape: f32[16,128], index: 0, kind: input, shape index: {}]   ;;  %s335_s1 = inlined_call_operand.hbm [shape: f32[128,128], index: 1, kind: input, shape index: {}]   ;;  %s336_s2 = inlined_call_operand.vmem [shape: f32[1,128], index: 2, kind: input, shape index: {}]   ;;  %s337_s3 = inlined_call_operand.hbm [shape: f32[16,128], index: 3, kind: output, shape index: {}]  }
   0x1   :  { %9 = vsyncpa [#allocation6], 0 }
   0x2   :  { %10 = vsyncpa [#allocation4], 0  ;;  %s288_s12 = smov [#allocation2]  }
   0x3   :  { %s16_s13 = sshll.u32 %s288_s12, 4  ;;  %s17_s13 = int_to_ptr.vmem [resolvable:$true] %s16_s13 }
   0x4   :  { %s230_s14 = scalar_lea.vmem %s17_s13, 256  ;;  %p235_p1 = scmp.lt.s32.totalorder %s17_s13, %s17_s13 }
   0x5   :  { %p231_p0 = scmp.ne.s32.totalorder %s17_s13, %s230_s14  ;;  %p236_p2 = scmp.lt.s32.totalorder %s230_s14, %s230_s14 }
   0x7   :  { %p237_p3 = por %p236_p2, %p235_p1 }
   0x9   :  { %p238_p4 = pnand %p237_p3, %p231_p0 }
   0xb   :  { %241 = shalt.err (!%p238_p4)
}
   0xc   :  { %s289_s15 = smov 128   ;;  %s290_s16 = smov 8  }
   0xd   :  { %22 = dma.hbm_to_vmem [thread:$0]  %s334_s0, 256, %s17_s13, [#allocation3], %s289_s15, %s289_s15, %s290_s16  }
   0xe   :  { %s291_s19 = smov [#allocation5]  }
   0xf   :  { %s28_s20 = sshll.u32 %s291_s19, 4  ;;  %s29_s20 = int_to_ptr.vmem [resolvable:$true] %s28_s20 }
  0x10   :  { %s250_s21 = scalar_lea.vmem %s29_s20, 2048  ;;  %p255_p6 = scmp.lt.s32.totalorder %s29_s20, %s29_s20 }
  0x11   :  { %p251_p5 = scmp.ne.s32.totalorder %s29_s20, %s250_s21  ;;  %p256_p7 = scmp.lt.s32.totalorder %s250_s21, %s250_s21 }
  0x13   :  { %p257_p8 = por %p256_p7, %p255_p6 }
  0x15   :  { %p258_p9 = pnand %p257_p8, %p251_p5 }
  0x17   :  { %261 = shalt.err (!%p258_p9)
}
  0x18   :  { %34 = dma.hbm_to_vmem [thread:$0]  %s335_s1, 2048, %s29_s20, [#allocation6], %s289_s15, %s289_s15, %s290_s16  }
  0x19   :  { %282 = dma.done.wait [#allocation3], 256  }
  0x1a   :  { %283 = vsyncadd [#allocation3], 4294967040 }
  0x1b   :  { %284 = dma.done.wait [#allocation6], 2048  }
  0x1c   :  { %285 = vsyncadd [#allocation6], 4294965248  ;;  %v60_v0 = vld [vmem:[#allocation5 + $0x78] sm:$0xff]  ;;  %v59_v1 = vld [vmem:[#allocation5 + $0x70] sm:$0xff]  ;;  %s292_s24 = smov [#allocation7]  }
  0x1d   :  { %182 = vmatprep.subr.mxu0 %v60_v0  ;;  %v58_v2 = vld [vmem:[#allocation5 + $0x68] sm:$0xff]  ;;  %v43_v3 = vld [vmem:[#allocation2] sm:$0xff]  ;;  %v57_v4 = vld [vmem:[#allocation5 + $0x60] sm:$0xff]  ;;  %s150_s25 = sshll.u32 %s292_s24, 4  ;;  %s151_s25 = int_to_ptr.vmem [resolvable:$true] %s150_s25 }
  0x1e   :  { %183 = vmatpush3.xpose.msra.mxu0 %v60_v0  ;;  %214 = vmatprep.mubr.f32.mxu0 %v43_v3  ;;  %v56_v5 = vld [vmem:[#allocation5 + $0x58] sm:$0xff]  ;;  %v55_v6 = vld [vmem:[#allocation5 + $0x50] sm:$0xff]  ;;  %v54_v7 = vld [vmem:[#allocation5 + $0x48] sm:$0xff]  ;;  %s262_s26 = scalar_lea.vmem %s151_s25, 256  ;;  %p267_p11 = scmp.lt.s32.totalorder %s151_s25, %s151_s25 }
  0x1f   :  { %184 = vmatprep.subr.mxu0 %v59_v1  ;;  %v53_v8 = vld [vmem:[#allocation5 + $0x40] sm:$0xff]  ;;  %v52_v9 = vld [vmem:[#allocation5 + $0x38] sm:$0xff]  ;;  %v51_v10 = vld [vmem:[#allocation5 + $0x30] sm:$0xff]  ;;  %p263_p10 = scmp.ne.s32.totalorder %s151_s25, %s262_s26  ;;  %p268_p12 = scmp.lt.s32.totalorder %s262_s26, %s262_s26 }
  0x20   :  { %v50_v11 = vld [vmem:[#allocation5 + $0x28] sm:$0xff]  ;;  %v49_v12 = vld [vmem:[#allocation5 + $0x20] sm:$0xff]  ;;  %v48_v13 = vld [vmem:[#allocation5 + $0x18] sm:$0xff] }
  0x21   :  { %v47_v14 = vld [vmem:[#allocation5 + $0x10] sm:$0xff]  ;;  %v46_v15 = vld [vmem:[#allocation5 + $0x8] sm:$0xff]  ;;  %v45_v16 = vld [vmem:[#allocation5] sm:$0xff]  ;;  %p269_p13 = por %p268_p12, %p267_p11 }
  0x22   :  { %185 = vmatpush3.xpose.msra.mxu0 %v59_v1  ;;  %v44_v17 = vld [vmem:[#allocation2 + $0x8] sm:$0xff]  ;;  %v163_v18 = vld [vmem:[%s336_s2] ss:$0 sm:$0xff] }
  0x23   :  { %186 = vmatprep.subr.mxu0 %v58_v2  ;;  %p270_p0 = pnand %p269_p13, %p263_p10 }
  0x26   :  { %187 = vmatpush3.xpose.msra.mxu0 %v58_v2 }
  0x27   :  { %188 = vmatprep.subr.mxu0 %v57_v4 }
  0x2a   :  { %189 = vmatpush3.xpose.msra.mxu0 %v57_v4 }
  0x2b   :  { %190 = vmatprep.subr.mxu0 %v56_v5 }
  0x2e   :  { %191 = vmatpush3.xpose.msra.mxu0 %v56_v5 }
  0x2f   :  { %192 = vmatprep.subr.mxu0 %v55_v6 }
  0x32   :  { %193 = vmatpush3.xpose.msra.mxu0 %v55_v6 }
  0x33   :  { %194 = vmatprep.subr.mxu0 %v54_v7 }
  0x36   :  { %195 = vmatpush3.xpose.msra.mxu0 %v54_v7 }
  0x37   :  { %196 = vmatprep.subr.mxu0 %v53_v8 }
  0x3a   :  { %197 = vmatpush3.xpose.msra.mxu0 %v53_v8 }
  0x3b   :  { %198 = vmatprep.subr.mxu0 %v52_v9 }
  0x3e   :  { %199 = vmatpush3.xpose.msra.mxu0 %v52_v9 }
  0x3f   :  { %200 = vmatprep.subr.mxu0 %v51_v10 }
  0x42   :  { %201 = vmatpush3.xpose.msra.mxu0 %v51_v10 }
  0x43   :  { %202 = vmatprep.subr.mxu0 %v50_v11 }
  0x46   :  { %203 = vmatpush3.xpose.msra.mxu0 %v50_v11 }
  0x47   :  { %204 = vmatprep.subr.mxu0 %v49_v12 }
  0x4a   :  { %205 = vmatpush3.xpose.msra.mxu0 %v49_v12 }
  0x4b   :  { %206 = vmatprep.subr.mxu0 %v48_v13 }
  0x4e   :  { %207 = vmatpush3.xpose.msra.mxu0 %v48_v13 }
  0x4f   :  { %208 = vmatprep.subr.mxu0 %v47_v14 }
  0x52   :  { %209 = vmatpush3.xpose.msra.mxu0 %v47_v14 }
  0x53   :  { %210 = vmatprep.subr.mxu0 %v46_v15 }
  0x56   :  { %211 = vmatpush3.xpose.msra.mxu0 %v46_v15 }
  0x57   :  { %212 = vmatprep.subr.mxu0 %v45_v16 }
  0x5a   :  { %213 = vmatpush3.xpose.msra.mxu0 %v45_v16 }
  0x5d   :  { %215 = vmatmul.mubr.f32.vlgmr.msra.gmra.mxu0 %v44_v17 }
 0x11d   :  { %v216_v19 = vpop.f32.mrf.mxu0 }
 0x11e   :  { %v140_v20 = vadd.f32 %v216_v19, %v163_v18 }
 0x11f   :  { %v134_v21 = vpop.f32.mrf.mxu0 }
 0x120   :  { %144 = vst [vmem:[#allocation7 + $0x8] sm:$0xff] %v140_v20  ;;  %v135_v22 = vadd.f32 %v163_v18, %v134_v21 }
 0x122   :  { %143 = vst [vmem:[#allocation7] sm:$0xff] %v135_v22 }
 0x123   :  { %273 = shalt.err (!%p270_p0)
}
 0x124   :  { %156 = dma.vmem_to_hbm [thread:$0]  %s151_s25, 256, %s337_s3, [#allocation4], %s289_s15, %s289_s15, %s290_s16  }
 0x125   :  { %286 = dma.done.wait [#allocation4], 256  }
 0x126   :  { %287 = vsyncadd [#allocation4], 4294967040 }
 0x127   :  { %160 = vsyncpa [#allocation3], 1 }
 0x128   :  { %161 = vsyncpa [#allocation6], 1 }
 0x129   :  { %162 = vsyncpa [#allocation4], 1 }

</bundles_post_ra>
